<compile_context>
chip_gen: v7x
topology: tpu7x:2x2x1
jax: 0.10.0
libtpu: 0.0.40
codegen_flags: <defaults>
</compile_context>

<pallas_src>
import math

import jax
import jax.numpy as jnp
from jax.experimental import pallas as pl
from jax.experimental.pallas import tpu as pltpu


def _round_up(v, m):
    return ((v + m - 1) // m) * m


def _support_kernel(x_ref, wt_ref, b_ref, out_ref):
    # support = x @ W^T + b.  Weight arrives pre-transposed as (input, o_pad),
    # so the MXU consumes it directly (no in-kernel .T / XLU transpose).
    acc = jnp.dot(x_ref[...], wt_ref[...], preferred_element_type=jnp.float32)
    out_ref[...] = (acc + b_ref[...]).astype(out_ref.dtype)


def _aggregate_kernel(adj_ref, s_ref, out_ref, acc_ref):
    # out = adj @ support, tiled over (row tiles, contraction tiles) with an
    # f32 VMEM accumulator that lives across the "arbitrary" k axis.
    @pl.when(pl.program_id(1) == 0)
    def _():
        acc_ref[...] = jnp.zeros_like(acc_ref)

    acc_ref[...] += jnp.dot(
        adj_ref[...], s_ref[...], preferred_element_type=jnp.float32
    )

    @pl.when(pl.program_id(1) == pl.num_programs(1) - 1)
    def _():
        out_ref[...] = acc_ref[...].astype(out_ref.dtype)


def graph_convolution(x, weight, bias, adj, *,
                      compute_dtype=jnp.bfloat16, tm=128, tk=128):
    """Pallas implementation of GraphConvolution.forward.

    x:      (N, input_size) float32
    weight: (output_size, input_size)
    bias:   (output_size,)
    adj:    (N, N)
    returns (1, N * output_size) float32
    """
    n, input_size = x.shape
    output_size = weight.shape[0]
    cd = jnp.dtype(compute_dtype)
    cd_bytes = cd.itemsize

    # Lane-dense output: pad output features to a 128 multiple so every store
    # is an unmasked vst instead of an 87%-masked vst.msk.
    o_pad = _round_up(output_size, 128)
    # Rows / adj contraction dim padded to the tiling.
    n_pad = _round_up(n, math.lcm(tm, tk))

    # Pad + cast once in XLA (free for static weights, halves adj HBM traffic
    # when compute_dtype=bf16).  Bias stays f32 and is added to the f32 acc.
    x_p = jnp.zeros((n_pad, input_size), cd).at[:n, :].set(x.astype(cd))
    wt_p = jnp.zeros((input_size, o_pad), cd).at[:, :output_size].set(
        weight.T.astype(cd))
    b_p = jnp.zeros((1, o_pad), jnp.float32).at[0, :output_size].set(
        bias.astype(jnp.float32))
    adj_p = jnp.zeros((n_pad, n_pad), cd).at[:n, :n].set(adj.astype(cd))

    # ---- stage 1: support = x @ W^T + b ------------------------------------
    support_cost = pl.CostEstimate(
        flops=2 * n_pad * input_size * o_pad,
        transcendentals=0,
        bytes_accessed=(n_pad * input_size * cd_bytes
                        + input_size * o_pad * cd_bytes
                        + o_pad * 4
                        + n_pad * o_pad * cd_bytes),
    )
    support = pl.pallas_call(
        _support_kernel,
        out_shape=jax.ShapeDtypeStruct((n_pad, o_pad), cd),
        grid=(n_pad // tm,),
        in_specs=[
            pl.BlockSpec((tm, input_size), lambda i: (i, 0)),
            pl.BlockSpec((input_size, o_pad), lambda i: (0, 0)),
            pl.BlockSpec((1, o_pad), lambda i: (0, 0)),
        ],
        out_specs=pl.BlockSpec((tm, o_pad), lambda i: (i, 0)),
        compiler_params=pltpu.CompilerParams(
            dimension_semantics=("parallel",)),
        cost_estimate=support_cost,
    )(x_p, wt_p, b_p)

    # ---- stage 2: out = adj @ support --------------------------------------
    agg_cost = pl.CostEstimate(
        flops=2 * n_pad * n_pad * o_pad,
        transcendentals=0,
        bytes_accessed=(n_pad * n_pad * cd_bytes
                        + n_pad * o_pad * cd_bytes
                        + n_pad * o_pad * 4),
    )
    out_pad = pl.pallas_call(
        _aggregate_kernel,
        out_shape=jax.ShapeDtypeStruct((n_pad, o_pad), jnp.float32),
        grid=(n_pad // tm, n_pad // tk),
        in_specs=[
            pl.BlockSpec((tm, tk), lambda i, k: (i, k)),
            pl.BlockSpec((tk, o_pad), lambda i, k: (k, 0)),
        ],
        out_specs=pl.BlockSpec((tm, o_pad), lambda i, k: (i, 0)),
        scratch_shapes=[pltpu.VMEM((tm, o_pad), jnp.float32)],
        compiler_params=pltpu.CompilerParams(
            dimension_semantics=("parallel", "arbitrary")),
        cost_estimate=agg_cost,
    )(adj_p, support)

    # Slice the padding away; torch's output.view(1, -1).
    return out_pad[:n, :output_size].reshape(1, -1)


if __name__ == "__main__":
    # Shapes implied by the module: N nodes, input_size -> output_size features.
    N = 8
    INPUT_SIZE = 32
    OUTPUT_SIZE = 16

    key = jax.random.PRNGKey(0)
    k_x, k_adj, k_w, k_b = jax.random.split(key, 4)

    x = jax.random.normal(k_x, (N, INPUT_SIZE), dtype=jnp.float32)
    adj = jax.random.normal(k_adj, (N, N), dtype=jnp.float32)

    # nn.Linear-style uniform(-1/sqrt(in), 1/sqrt(in)) init.
    bound = 1.0 / math.sqrt(INPUT_SIZE)
    weight = jax.random.uniform(
        k_w, (OUTPUT_SIZE, INPUT_SIZE), minval=-bound, maxval=bound,
        dtype=jnp.float32)
    bias = jax.random.uniform(
        k_b, (OUTPUT_SIZE,), minval=-bound, maxval=bound, dtype=jnp.float32)

    # Plain-JAX reference (same math as the PyTorch forward).
    ref = (adj @ (x @ weight.T + bias)).reshape(1, -1)

    # f32 path: tight tolerance.
    out_f32 = graph_convolution(x, weight, bias, adj,
                                compute_dtype=jnp.float32)
    jax.block_until_ready(out_f32)
    assert out_f32.shape == (1, N * OUTPUT_SIZE)
    assert jnp.allclose(out_f32, ref, atol=1e-4, rtol=1e-4)

    # Default bf16-input / f32-accumulate path (v6e/v7x MXU recommendation).
    out_bf16 = graph_convolution(x, weight, bias, adj)
    jax.block_until_ready(out_bf16)
    assert out_bf16.shape == (1, N * OUTPUT_SIZE)
    assert jnp.allclose(out_bf16, ref, atol=5e-2, rtol=5e-2)

    print("KERNEL_OK")
</pallas_src>

<mosaic_0001>
module attributes {stable_mosaic.version = 11 : i64} {
  func.func @_support_kernel(%arg0: i32, %arg1: memref<128x32xf32, #tpu.memory_space<vmem>>, %arg2: memref<32x128xf32, #tpu.memory_space<vmem>>, %arg3: memref<1x128xf32, #tpu.memory_space<vmem>>, %arg4: memref<128x128xf32, #tpu.memory_space<vmem>>) attributes {dimension_semantics = [#tpu.dimension_semantics<parallel>], iteration_bounds = array<i64: 1>, scalar_prefetch = 0 : i64, scratch_operands = 0 : i64, tpu.core_type = #tpu.core_type<tc>, window_params = [{transform_indices = @transform_0, window_bounds = array<i64: 128, 32>}, {pipeline_mode = #tpu.pipeline_mode<synchronous>, transform_indices = @transform_1, window_bounds = array<i64: 32, 128>}, {pipeline_mode = #tpu.pipeline_mode<synchronous>, transform_indices = @transform_2, window_bounds = array<i64: 1, 128>}, {transform_indices = @transform_3, window_bounds = array<i64: 128, 128>}]} {
    %c0 = arith.constant 0 : index
    %c0_0 = arith.constant 0 : index
    %0 = vector.load %arg1[%c0, %c0_0] : memref<128x32xf32, #tpu.memory_space<vmem>>, vector<128x32xf32>
    %c0_1 = arith.constant 0 : index
    %c0_2 = arith.constant 0 : index
    %1 = vector.load %arg2[%c0_1, %c0_2] : memref<32x128xf32, #tpu.memory_space<vmem>>, vector<32x128xf32>
    %cst = arith.constant dense<0.000000e+00> : vector<128x128xf32>
    %2 = tpu.matmul %0, %1, %cst {dimension_numbers = #tpu.dot_dimension_numbers<[1], [0], [0], [1], [0, 0, 1, 1], [], []>} : vector<128x32xf32>, vector<32x128xf32>, vector<128x128xf32> -> vector<128x128xf32>
    %c0_3 = arith.constant 0 : index
    %c0_4 = arith.constant 0 : index
    %3 = vector.load %arg3[%c0_3, %c0_4] : memref<1x128xf32, #tpu.memory_space<vmem>>, vector<1x128xf32>
    %4 = vector.broadcast %3 : vector<1x128xf32> to vector<128x128xf32>
    %5 = arith.addf %2, %4 : vector<128x128xf32>
    %c0_5 = arith.constant 0 : index
    %c0_6 = arith.constant 0 : index
    %6 = vector.load %arg4[%c0_5, %c0_6] : memref<128x128xf32, #tpu.memory_space<vmem>>, vector<128x128xf32>
    tpu.vector_store %arg4[%c0_5, %c0_6], %5 {strides = array<i32>} : memref<128x128xf32, #tpu.memory_space<vmem>>, vector<128x128xf32>,
    return
  }
  func.func @transform_0(%arg0: i32) -> (i32, i32) {
    %c0_i32 = arith.constant 0 : i32
    %c0_i32_0 = arith.constant 0 : i32
    return %arg0, %c0_i32 : i32, i32
  }
  func.func @transform_1(%arg0: i32) -> (i32, i32) {
    %c0_i32 = arith.constant 0 : i32
    %c0_i32_0 = arith.constant 0 : i32
    %c0_i32_1 = arith.constant 0 : i32
    return %c0_i32, %c0_i32_0 : i32, i32
  }
  func.func @transform_2(%arg0: i32) -> (i32, i32) {
    %c0_i32 = arith.constant 0 : i32
    %c0_i32_0 = arith.constant 0 : i32
    %c0_i32_1 = arith.constant 0 : i32
    return %c0_i32, %c0_i32_0 : i32, i32
  }
  func.func @transform_3(%arg0: i32) -> (i32, i32) {
    %c0_i32 = arith.constant 0 : i32
    %c0_i32_0 = arith.constant 0 : i32
    return %arg0, %c0_i32 : i32, i32
  }
}

</mosaic_0001>

<bundles_post_ra>
// kernel: tpu_custom_call.1
= control target key start
LH: loop header
LB: loop body
LE: loop exit
PB: predicated region body
PF: predicated region fallthrough
CT: control target
= control target key end

     0   :  { %vm42_vm0 = vcmask 261120   ;;  %s490_s0 = inlined_call_operand.vmem [shape: f32[128,32], index: 0, kind: input, shape index: {}]   ;;  %s491_s1 = inlined_call_operand.vmem [shape: f32[32,128], index: 1, kind: input, shape index: {}]   ;;  %s492_s2 = inlined_call_operand.vmem [shape: f32[1,128], index: 2, kind: input, shape index: {}]   ;;  %s493_s3 = inlined_call_operand.hbm [shape: f32[128,128], index: 3, kind: output, shape index: {}]  }
   0x1   :  { %v31_v0 = vld [vmem:[%s491_s1] sm:$0xff]  ;;  %v32_v1 = vld [vmem:[%s491_s1 + $0x8] sm:$0xff]  ;;  %v33_v2 = vld [vmem:[%s491_s1 + $0x10] sm:$0xff] }
   0x2   :  { %v337_v3 = vpack.c.bf16 %v32_v1, %v31_v0  ;;  %v34_v4 = vld [vmem:[%s491_s1 + $0x18] sm:$0xff]  ;;  %v15_v5 = vld [vmem:[%s490_s0] sm:$0xff] }
   0x3   :  { %v23_v6 = vld [vmem:[%s490_s0 + $0x40] sm:$0xff]  ;;  %v341_v7 = vpack.c.bf16 %v34_v4, %v33_v2  ;;  %313 = vmatprep.mubr.msk.f32.mxu0 %vm42_vm0, %v15_v5 }
   0x4   :  { %325 = vmatprep.mubr.msk.f32.mxu1 %vm42_vm0, %v23_v6  ;;  %338 = vmatprep.subr.bf16.mxu0 %v337_v3 }
   0x5   :  { %345 = vmatprep.subr.bf16.mxu1 %v337_v3  ;;  %340 = vmatpush3.bf16.msra.mxu0 %v337_v3 }
   0x6   :  { %347 = vmatpush3.bf16.msra.mxu1 %v337_v3  ;;  %342 = vmatprep.subr.bf16.mxu0 %v341_v7 }
   0x7   :  { %346 = vmatprep.subr.bf16.mxu1 %v341_v7 }
   0x8   :  { %8 = vsyncpa [#allocation3], 0  ;;  %v16_v8 = vld [vmem:[%s490_s0 + $0x8] sm:$0xff]  ;;  %v17_v10 = vld [vmem:[%s490_s0 + $0x10] sm:$0xff] }
   0x9   :  { %344 = vmatpush3.bf16.msra.mxu0 %v341_v7  ;;  %v24_v9 = vld [vmem:[%s490_s0 + $0x48] sm:$0xff]  ;;  %v25_v11 = vld [vmem:[%s490_s0 + $0x50] sm:$0xff]  ;;  %v18_v12 = vld [vmem:[%s490_s0 + $0x18] sm:$0xff] }
   0xa   :  { %348 = vmatpush3.bf16.msra.mxu1 %v341_v7  ;;  %v26_v13 = vld [vmem:[%s490_s0 + $0x58] sm:$0xff]  ;;  %v19_v14 = vld [vmem:[%s490_s0 + $0x20] sm:$0xff]  ;;  %v20_v16 = vld [vmem:[%s490_s0 + $0x28] sm:$0xff] }
   0xb   :  { %v27_v15 = vld [vmem:[%s490_s0 + $0x60] sm:$0xff]  ;;  %v28_v17 = vld [vmem:[%s490_s0 + $0x68] sm:$0xff]  ;;  %v21_v18 = vld [vmem:[%s490_s0 + $0x30] sm:$0xff] }
   0xc   :  { %314 = vmatmul.mubr.msk.f32.vlgmr.msra.gmra.mrb[0].mxu0 %vm42_vm0, %v16_v8  ;;  %v29_v19 = vld [vmem:[%s490_s0 + $0x70] sm:$0xff]  ;;  %v22_v20 = vld [vmem:[%s490_s0 + $0x38] sm:$0xff]  ;;  %v268_v22 = vld [vmem:[%s492_s2] ss:$0 sm:$0xff] }
   0xd   :  { %326 = vmatmul.mubr.msk.f32.vlgmr.msra.gmra.mrb[0].mxu1 %vm42_vm0, %v24_v9  ;;  %316 = vmatprep.mubr.msk.f32.mxu0 %vm42_vm0, %v17_v10  ;;  %v30_v21 = vld [vmem:[%s490_s0 + $0x78] sm:$0xff]  ;;  %s376_s0 = smov [#allocation2]  }
   0xe   :  { %328 = vmatprep.mubr.msk.f32.mxu1 %vm42_vm0, %v25_v11  ;;  %s257_s2 = sshll.u32 %s376_s0, 4  ;;  %s258_s2 = int_to_ptr.vmem [resolvable:$true] %s257_s2 }
   0xf   :  { %s352_s25 = scalar_lea.vmem %s258_s2, 2048  ;;  %p357_p1 = scmp.lt.s32.totalorder %s258_s2, %s258_s2 }
  0x10   :  { %317 = vmatmul.mubr.msk.f32.gmra.mrb[2].mxu0 %vm42_vm0, %v18_v12  ;;  %p353_p0 = scmp.ne.s32.totalorder %s258_s2, %s352_s25  ;;  %p358_p2 = scmp.lt.s32.totalorder %s352_s25, %s352_s25 }
  0x11   :  { %329 = vmatmul.mubr.msk.f32.gmra.mrb[2].mxu1 %vm42_vm0, %v26_v13  ;;  %319 = vmatprep.mubr.msk.f32.mxu0 %vm42_vm0, %v19_v14 }
  0x12   :  { %331 = vmatprep.mubr.msk.f32.mxu1 %vm42_vm0, %v27_v15  ;;  %p359_p3 = por %p358_p2, %p357_p1 }
  0x14   :  { %320 = vmatmul.mubr.msk.f32.gmra.mrb[4].mxu0 %vm42_vm0, %v20_v16  ;;  %p360_p4 = pnand %p359_p3, %p353_p0 }
  0x15   :  { %332 = vmatmul.mubr.msk.f32.gmra.mrb[4].mxu1 %vm42_vm0, %v28_v17  ;;  %322 = vmatprep.mubr.msk.f32.mxu0 %vm42_vm0, %v21_v18 }
  0x16   :  { %334 = vmatprep.mubr.msk.f32.mxu1 %vm42_vm0, %v29_v19 }
  0x18   :  { %323 = vmatmul.mubr.msk.f32.gmra.mrb[6].mxu0 %vm42_vm0, %v22_v20 }
  0x19   :  { %335 = vmatmul.mubr.msk.f32.gmra.mrb[6].mxu1 %vm42_vm0, %v30_v21 }
  0xdf   :  { %v315_v23 = vpop.f32.mrb[0].mxu0 }
  0xe0   :  { %v327_v24 = vpop.f32.mrb[0].mxu1  ;;  %v163_v25 = vadd.f32 %v315_v23, %v268_v22  ;;  %v157_v27 = vpop.f32.mrb[1].mxu0 }
  0xe1   :  { %v203_v26 = vadd.f32 %v327_v24, %v268_v22  ;;  %v197_v28 = vpop.f32.mrb[1].mxu1  ;;  %v158_v29 = vadd.f32 %v268_v22, %v157_v27 }
  0xe2   :  { %v198_v30 = vadd.f32 %v268_v22, %v197_v28  ;;  %237 = vst [vmem:[#allocation2 + $0x8] sm:$0xff] %v163_v25 }
  0xe3   :  { %245 = vst [vmem:[#allocation2 + $0x48] sm:$0xff] %v203_v26  ;;  %236 = vst [vmem:[#allocation2] sm:$0xff] %v158_v29  ;;  %v318_v31 = vpop.f32.mrb[2].mxu0 }
  0xe4   :  { %244 = vst [vmem:[#allocation2 + $0x40] sm:$0xff] %v198_v30  ;;  %v330_v32 = vpop.f32.mrb[2].mxu1  ;;  %v173_v33 = vadd.f32 %v318_v31, %v268_v22  ;;  %v167_v35 = vpop.f32.mrb[3].mxu0 }
  0xe5   :  { %v213_v34 = vadd.f32 %v330_v32, %v268_v22  ;;  %v207_v36 = vpop.f32.mrb[3].mxu1  ;;  %v168_v37 = vadd.f32 %v268_v22, %v167_v35 }
  0xe6   :  { %v208_v38 = vadd.f32 %v268_v22, %v207_v36  ;;  %239 = vst [vmem:[#allocation2 + $0x18] sm:$0xff] %v173_v33 }
  0xe7   :  { %247 = vst [vmem:[#allocation2 + $0x58] sm:$0xff] %v213_v34  ;;  %238 = vst [vmem:[#allocation2 + $0x10] sm:$0xff] %v168_v37  ;;  %v321_v39 = vpop.f32.mrb[4].mxu0 }
  0xe8   :  { %246 = vst [vmem:[#allocation2 + $0x50] sm:$0xff] %v208_v38  ;;  %v333_v40 = vpop.f32.mrb[4].mxu1  ;;  %v183_v41 = vadd.f32 %v321_v39, %v268_v22  ;;  %v177_v43 = vpop.f32.mrb[5].mxu0 }
  0xe9   :  { %v223_v42 = vadd.f32 %v333_v40, %v268_v22  ;;  %v217_v44 = vpop.f32.mrb[5].mxu1  ;;  %v178_v45 = vadd.f32 %v268_v22, %v177_v43 }
  0xea   :  { %v218_v46 = vadd.f32 %v268_v22, %v217_v44  ;;  %241 = vst [vmem:[#allocation2 + $0x28] sm:$0xff] %v183_v41 }
  0xeb   :  { %249 = vst [vmem:[#allocation2 + $0x68] sm:$0xff] %v223_v42  ;;  %240 = vst [vmem:[#allocation2 + $0x20] sm:$0xff] %v178_v45  ;;  %v324_v47 = vpop.f32.mrb[6].mxu0 }
  0xec   :  { %248 = vst [vmem:[#allocation2 + $0x60] sm:$0xff] %v218_v46  ;;  %v336_v48 = vpop.f32.mrb[6].mxu1  ;;  %v193_v49 = vadd.f32 %v324_v47, %v268_v22  ;;  %v187_v51 = vpop.f32.mrb[7].mxu0 }
  0xed   :  { %v233_v50 = vadd.f32 %v336_v48, %v268_v22  ;;  %v227_v52 = vpop.f32.mrb[7].mxu1  ;;  %v188_v53 = vadd.f32 %v268_v22, %v187_v51 }
  0xee   :  { %v228_v54 = vadd.f32 %v268_v22, %v227_v52  ;;  %243 = vst [vmem:[#allocation2 + $0x38] sm:$0xff] %v193_v49 }
  0xef   :  { %251 = vst [vmem:[#allocation2 + $0x78] sm:$0xff] %v233_v50  ;;  %242 = vst [vmem:[#allocation2 + $0x30] sm:$0xff] %v188_v53 }
  0xf0   :  { %250 = vst [vmem:[#allocation2 + $0x70] sm:$0xff] %v228_v54 }
  0xf1   :  { %363 = shalt.err (!%p360_p4)
}
  0xf2   :  { %s364_s28 = scalar_lea.hbm %s493_s3, 2048 }
  0xf3   :  { %p365_p5 = scmp.ne.s32.totalorder %s493_s3, %s364_s28  ;;  %p368_p6 = scmp.lt.u32.totalorder %s364_s28, %s493_s3 }
  0xf5   :  { %p370_p7 = pnand %p368_p6, %p365_p5 }
  0xf7   :  { %373 = shalt.err (!%p370_p7)
}
  0xf8   :  { %s377_s6 = smov 128   ;;  %s378_s7 = smov 8  }
  0xf9   :  { %263 = dma.vmem_to_hbm [thread:$0]  %s258_s2, 2048, %s493_s3, [#allocation3], %s377_s6, %s377_s6, %s378_s7  }
  0xfa   :  { %374 = dma.done.wait [#allocation3], 2048  }
  0xfb   :  { %375 = vsyncadd [#allocation3], 4294965248 }
  0xfc   :  { %267 = vsyncpa [#allocation3], 1 }

</bundles_post_ra>
